<compile_context>
chip_gen: v7x
topology: tpu7x:2x2x1
jax: 0.10.0
libtpu: 0.0.40
codegen_flags: <defaults>
</compile_context>

<pallas_src>
import jax
import jax.numpy as jnp
from jax.experimental import pallas as pl
from jax.experimental.pallas import tpu as pltpu

EPS = 1e-5
LANE = 128  # channel padding target (lane width)


def _bn_fused(acc, g, b, count):
    """Training-mode BatchNorm1d on (rows, C) f32, one pass, folded scale/bias."""
    inv_cnt = 1.0 / count
    s = jnp.sum(acc, axis=0, keepdims=True)             # (1, C)
    ss = jnp.sum(acc * acc, axis=0, keepdims=True)      # (1, C)
    mean = s * inv_cnt
    # Clamp: E[x^2] - mean^2 can go slightly negative from f32 cancellation.
    var = jnp.maximum(ss * inv_cnt - mean * mean, 0.0)
    scale = g * jax.lax.rsqrt(var + EPS)                 # (1, C)  (EUP)
    bias = b - mean * scale
    return acc * scale + bias                            # single FMA pass


def basic_block_kernel(xpad_ref, w1_ref, wsc_ref, g1_ref, b1_ref,
                       w2_ref, g2_ref, b2_ref, gsc_ref, bsc_ref,
                       o_ref, hpad_scr):
    n, lpad, cp = xpad_ref.shape
    k = w2_ref.shape[0]
    pad = k // 2
    l = lpad - 2 * pad
    rows = n * l
    kcp = k * cp
    assert w1_ref.shape[0] == kcp
    # Static (trace-time) branch: fused weight carries the shortcut in its
    # right half (built in the wrapper on 256-wide-MXU chips only).
    fused = (w1_ref.shape[1] == 2 * cp)

    xpad = xpad_ref[...]                                 # (n, lpad, cp) bf16

    # ---- conv1 (+ optionally the 1x1 shortcut): tap-stacked bf16 matmul ----
    x_stack = jnp.concatenate(
        [xpad[:, j:j + l, :] for j in range(k)], axis=-1).reshape(rows, kcp)

    if fused:
        acc = jnp.dot(x_stack, w1_ref[...], preferred_element_type=jnp.float32)
        acc1 = acc[:, :cp]                               # conv1 pre-BN
        sc = acc[:, cp:]                                 # shortcut pre-BN
    else:
        acc1 = jnp.dot(x_stack, w1_ref[...], preferred_element_type=jnp.float32)
        x_mid = x_stack[:, pad * cp:(pad + 1) * cp]      # == unpadded x (bf16)
        sc = jnp.dot(x_mid, wsc_ref[...], preferred_element_type=jnp.float32)

    out1 = jnp.maximum(_bn_fused(acc1, g1_ref[...], b1_ref[...], rows), 0.0)
    out1_bf16 = out1.astype(jnp.bfloat16)                # single cast, rows*cp

    # ---- conv2: bf16 halo scratch + per-tap accumulating matmuls ----
    if pad > 0:
        halo = jnp.zeros((n, pad, cp), jnp.bfloat16)
        hpad_scr[:, pl.ds(0, pad), :] = halo
        hpad_scr[:, pl.ds(pad + l, pad), :] = halo
    hpad_scr[:, pl.ds(pad, l), :] = out1_bf16.reshape(n, l, cp)

    acc2 = jnp.zeros((rows, cp), jnp.float32)
    for j in range(k):
        tap = hpad_scr[:, pl.ds(j, l), :].reshape(rows, cp)   # bf16 slice
        acc2 = acc2 + jnp.dot(tap, w2_ref[j], preferred_element_type=jnp.float32)

    out2 = _bn_fused(acc2, g2_ref[...], b2_ref[...], rows)
    sc = _bn_fused(sc, gsc_ref[...], bsc_ref[...], rows)

    o_ref[...] = jnp.maximum(out2 + sc, 0.0)             # (rows, cp) f32, lane-dense


def _pad_to(x, axis, size):
    amt = size - x.shape[axis]
    if amt <= 0:
        return x
    cfg = [(0, 0)] * x.ndim
    cfg[axis] = (0, amt)
    return jnp.pad(x, cfg)


def _mxu_is_256_wide():
    """v6e / v7x have 256-wide MXUs -> fuse the shortcut into conv1's N dim.
    v5e (and older) are 128-wide -> keep the two separate N=128 matmuls."""
    try:
        kind = jax.devices()[0].device_kind.lower()
    except Exception:
        return False
    return ("v6" in kind) or ("v7" in kind) or ("trillium" in kind)


def make_params(key, in_ch, out_ch, k):
    k1, k2, k3 = jax.random.split(key, 3)
    params = {
        "w1": jax.random.normal(k1, (k, in_ch, out_ch), jnp.float32) * 0.1,
        "w2": jax.random.normal(k2, (k, out_ch, out_ch), jnp.float32) * 0.1,
        "wsc": jax.random.normal(k3, (in_ch, out_ch), jnp.float32) * 0.1,
    }
    base_g = 1.0 + 0.1 * jnp.arange(out_ch, dtype=jnp.float32)
    base_b = 0.05 * jnp.arange(out_ch, dtype=jnp.float32)
    for name, scale in (("1", 1.0), ("2", 0.9), ("sc", 1.1)):
        params["g" + name] = (base_g * scale).reshape(1, out_ch)
        params["b" + name] = (base_b * scale).reshape(1, out_ch)
    return params


def basic_block_1d(x_ncl, params, fuse_shortcut=None):
    """x_ncl: (N, C_in, L) f32 (PyTorch NCL). Returns (N, C_out, L) f32."""
    N, Cin, L = x_ncl.shape
    k, _, Cout = params["w1"].shape
    pad = k // 2
    CP = max(LANE, ((max(Cin, Cout) + LANE - 1) // LANE) * LANE)
    if fuse_shortcut is None:
        fuse_shortcut = _mxu_is_256_wide()

    # Layout plumbing (fuses into one XLA pass): NCL -> NLC, channel-pad to a
    # lane-dense multiple of 128, halo-pad L, and pre-cast to bf16 (the
    # matmuls are the only consumers; BN math only touches f32 accumulators).
    x_nlc = _pad_to(jnp.transpose(x_ncl, (0, 2, 1)).astype(jnp.float32), 2, CP)
    x_pad = jnp.pad(x_nlc, ((0, 0), (pad, pad), (0, 0))).astype(jnp.bfloat16)

    # Weights: channel-pad, tap-stack conv1 along the contraction dim, bf16.
    w1 = _pad_to(_pad_to(params["w1"].astype(jnp.float32), 1, CP), 2, CP).reshape(k * CP, CP)
    wsc = _pad_to(_pad_to(params["wsc"].astype(jnp.float32), 0, CP), 1, CP)       # (CP, CP)
    if fuse_shortcut:
        # (k*CP, 2*CP): left half = conv1 weights, right half = zeros except
        # the middle-tap block which holds the 1x1 shortcut weight.
        w1c = jnp.zeros((k * CP, 2 * CP), jnp.float32)
        w1c = w1c.at[:, :CP].set(w1)
        w1c = w1c.at[pad * CP:(pad + 1) * CP, CP:].set(wsc)
        w1c = w1c.astype(jnp.bfloat16)
    else:
        w1c = w1.astype(jnp.bfloat16)
    wsc_bf = wsc.astype(jnp.bfloat16)                    # unused when fused (tiny)
    w2 = _pad_to(_pad_to(params["w2"].astype(jnp.float32), 1, CP), 2, CP).astype(jnp.bfloat16)

    def pad_gb(p):   # pad BN affine params with zeros -> padded channels stay 0
        return _pad_to(p.astype(jnp.float32), 1, CP)

    vmem = pl.BlockSpec(memory_space=pltpu.MemorySpace.VMEM)
    out_2d = pl.pallas_call(
        basic_block_kernel,
        out_shape=jax.ShapeDtypeStruct((N * L, CP), jnp.float32),
        in_specs=[vmem] * 10,
        out_specs=vmem,
        scratch_shapes=[pltpu.VMEM((N, L + 2 * pad, CP), jnp.bfloat16)],
    )(x_pad, w1c, wsc_bf,
      pad_gb(params["g1"]), pad_gb(params["b1"]),
      w2, pad_gb(params["g2"]), pad_gb(params["b2"]),
      pad_gb(params["gsc"]), pad_gb(params["bsc"]))

    out_nlc = out_2d.reshape(N, L, CP)[:, :, :Cout]
    return jnp.transpose(out_nlc, (0, 2, 1))             # (N, Cout, L)


def ref_forward(x_ncl, params, k=3):
    """Pure-JAX reference mirroring the PyTorch forward (training-mode BN).
    Conv operands are rounded to bf16 with f32 accumulation, matching the
    kernel's MXU numerics, so the comparison is apples-to-apples."""
    pad = k // 2

    def conv(x, w_kio, padding):
        w = jnp.transpose(w_kio, (2, 1, 0))               # (out, in, k)
        return jax.lax.conv_general_dilated(
            x.astype(jnp.bfloat16), w.astype(jnp.bfloat16), (1,),
            ((padding, padding),),
            dimension_numbers=("NCW", "OIW", "NCW"),
            preferred_element_type=jnp.float32)

    def bn(y, g, b):                                      # y: (N, C, L)
        mean = jnp.mean(y, axis=(0, 2), keepdims=True)
        var = jnp.mean((y - mean) ** 2, axis=(0, 2), keepdims=True)
        return ((y - mean) * jax.lax.rsqrt(var + EPS)
                * g.reshape(1, -1, 1) + b.reshape(1, -1, 1))

    out = jax.nn.relu(bn(conv(x_ncl, params["w1"], pad), params["g1"], params["b1"]))
    out = bn(conv(out, params["w2"], pad), params["g2"], params["b2"])
    sc = bn(conv(x_ncl, params["wsc"][None], 0), params["gsc"], params["bsc"])
    return jax.nn.relu(out + sc)


if __name__ == "__main__":
    N, IN_CH, OUT_CH, L, K = 2, 4, 8, 16, 3

    key = jax.random.PRNGKey(0)
    kx, kp = jax.random.split(key)
    x = jax.random.normal(kx, (N, IN_CH, L), jnp.float32)  # PyTorch NCL
    params = make_params(kp, IN_CH, OUT_CH, K)

    out = jax.block_until_ready(jax.jit(basic_block_1d)(x, params))
    assert out.shape == (N, OUT_CH, L), out.shape

    ref = jax.block_until_ready(ref_forward(x, params, K))
    max_err = float(jnp.max(jnp.abs(out - ref)))
    assert jnp.allclose(out, ref, atol=2e-2, rtol=2e-2), max_err

    print("KERNEL_OK")
</pallas_src>

<mosaic_0001>
module attributes {stable_mosaic.version = 11 : i64} {
  func.func @basic_block_kernel(%arg0: memref<2x18x128xbf16, #tpu.memory_space<vmem>>, %arg1: memref<384x128xbf16, #tpu.memory_space<vmem>>, %arg2: memref<128x128xbf16, #tpu.memory_space<vmem>>, %arg3: memref<1x128xf32, #tpu.memory_space<vmem>>, %arg4: memref<1x128xf32, #tpu.memory_space<vmem>>, %arg5: memref<3x128x128xbf16, #tpu.memory_space<vmem>>, %arg6: memref<1x128xf32, #tpu.memory_space<vmem>>, %arg7: memref<1x128xf32, #tpu.memory_space<vmem>>, %arg8: memref<1x128xf32, #tpu.memory_space<vmem>>, %arg9: memref<1x128xf32, #tpu.memory_space<vmem>>, %arg10: memref<32x128xf32, #tpu.memory_space<vmem>>, %arg11: memref<2x18x128xbf16, #tpu.memory_space<vmem>>) attributes {dimension_semantics = [], scalar_prefetch = 0 : i64, scratch_operands = 1 : i64, tpu.core_type = #tpu.core_type<tc>} {
    %c0 = arith.constant 0 : index
    %c0_0 = arith.constant 0 : index
    %c0_1 = arith.constant 0 : index
    %0 = vector.load %arg0[%c0, %c0_0, %c0_1] : memref<2x18x128xbf16, #tpu.memory_space<vmem>>, vector<2x18x128xbf16>
    %1 = vector.extract_strided_slice %0 {offsets = [0, 0, 0], sizes = [2, 16, 128], strides = [1, 1, 1]} : vector<2x18x128xbf16> to vector<2x16x128xbf16>
    %2 = vector.extract_strided_slice %0 {offsets = [0, 1, 0], sizes = [2, 16, 128], strides = [1, 1, 1]} : vector<2x18x128xbf16> to vector<2x16x128xbf16>
    %3 = vector.extract_strided_slice %0 {offsets = [0, 2, 0], sizes = [2, 16, 128], strides = [1, 1, 1]} : vector<2x18x128xbf16> to vector<2x16x128xbf16>
    %4 = tpu.concatenate %1, %2, %3 in 2 : vector<2x16x128xbf16>, vector<2x16x128xbf16>, vector<2x16x128xbf16> -> vector<2x16x384xbf16>
    %5 = vector.shape_cast %4 : vector<2x16x384xbf16> to vector<32x384xbf16>
    %c0_2 = arith.constant 0 : index
    %c0_3 = arith.constant 0 : index
    %6 = vector.load %arg1[%c0_2, %c0_3] : memref<384x128xbf16, #tpu.memory_space<vmem>>, vector<384x128xbf16>
    %cst = arith.constant dense<0.000000e+00> : vector<32x128xf32>
    %7 = tpu.matmul %5, %6, %cst {dimension_numbers = #tpu.dot_dimension_numbers<[1], [0], [0], [1], [0, 0, 1, 1], [], []>} : vector<32x384xbf16>, vector<384x128xbf16>, vector<32x128xf32> -> vector<32x128xf32>
    %8 = vector.extract_strided_slice %5 {offsets = [0, 128], sizes = [32, 128], strides = [1, 1]} : vector<32x384xbf16> to vector<32x128xbf16>
    %c0_4 = arith.constant 0 : index
    %c0_5 = arith.constant 0 : index
    %9 = vector.load %arg2[%c0_4, %c0_5] : memref<128x128xbf16, #tpu.memory_space<vmem>>, vector<128x128xbf16>
    %cst_6 = arith.constant dense<0.000000e+00> : vector<32x128xf32>
    %10 = tpu.matmul %8, %9, %cst_6 {dimension_numbers = #tpu.dot_dimension_numbers<[1], [0], [0], [1], [0, 0, 1, 1], [], []>} : vector<32x128xbf16>, vector<128x128xbf16>, vector<32x128xf32> -> vector<32x128xf32>
    %c0_7 = arith.constant 0 : index
    %c0_8 = arith.constant 0 : index
    %11 = vector.load %arg3[%c0_7, %c0_8] : memref<1x128xf32, #tpu.memory_space<vmem>>, vector<1x128xf32>
    %c0_9 = arith.constant 0 : index
    %c0_10 = arith.constant 0 : index
    %12 = vector.load %arg4[%c0_9, %c0_10] : memref<1x128xf32, #tpu.memory_space<vmem>>, vector<1x128xf32>
    %cst_11 = arith.constant dense<0.000000e+00> : vector<128xf32>
    %13 = vector.multi_reduction <add>, %7, %cst_11 [0] : vector<32x128xf32> to vector<128xf32>
    %14 = vector.shape_cast %13 : vector<128xf32> to vector<1x128xf32>
    %15 = arith.mulf %7, %7 : vector<32x128xf32>
    %cst_12 = arith.constant dense<0.000000e+00> : vector<128xf32>
    %16 = vector.multi_reduction <add>, %15, %cst_12 [0] : vector<32x128xf32> to vector<128xf32>
    %17 = vector.shape_cast %16 : vector<128xf32> to vector<1x128xf32>
    %cst_13 = arith.constant 3.125000e-02 : f32
    %18 = vector.broadcast %cst_13 : f32 to vector<1x128xf32>
    %19 = arith.mulf %14, %18 : vector<1x128xf32>
    %cst_14 = arith.constant 3.125000e-02 : f32
    %20 = vector.broadcast %cst_14 : f32 to vector<1x128xf32>
    %21 = arith.mulf %17, %20 : vector<1x128xf32>
    %22 = arith.mulf %19, %19 : vector<1x128xf32>
    %23 = arith.subf %21, %22 : vector<1x128xf32>
    %cst_15 = arith.constant 0.000000e+00 : f32
    %24 = vector.broadcast %cst_15 : f32 to vector<1x128xf32>
    %25 = arith.maximumf %23, %24 : vector<1x128xf32>
    %cst_16 = arith.constant 9.99999974E-6 : f32
    %26 = vector.broadcast %cst_16 : f32 to vector<1x128xf32>
    %27 = arith.addf %25, %26 : vector<1x128xf32>
    %28 = math.rsqrt %27 : vector<1x128xf32>
    %29 = arith.mulf %11, %28 : vector<1x128xf32>
    %30 = arith.mulf %19, %29 : vector<1x128xf32>
    %31 = arith.subf %12, %30 : vector<1x128xf32>
    %32 = vector.broadcast %29 : vector<1x128xf32> to vector<32x128xf32>
    %33 = arith.mulf %7, %32 : vector<32x128xf32>
    %34 = vector.broadcast %31 : vector<1x128xf32> to vector<32x128xf32>
    %35 = arith.addf %33, %34 : vector<32x128xf32>
    %cst_17 = arith.constant 0.000000e+00 : f32
    %36 = vector.broadcast %cst_17 : f32 to vector<32x128xf32>
    %37 = arith.maximumf %35, %36 : vector<32x128xf32>
    %38 = arith.truncf %37 : vector<32x128xf32> to vector<32x128xbf16>
    %cst_18 = arith.constant 0.000000e+00 : bf16
    %39 = vector.broadcast %cst_18 : bf16 to vector<2x1x128xbf16>
    %c0_19 = arith.constant 0 : index
    %c0_20 = arith.constant 0 : index
    %c0_21 = arith.constant 0 : index
    %40 = vector.load %arg11[%c0_19, %c0_20, %c0_21] : memref<2x18x128xbf16, #tpu.memory_space<vmem>>, vector<2x1x128xbf16>
    tpu.vector_store %arg11[%c0_19, %c0_20, %c0_21], %39 {strides = array<i32>} : memref<2x18x128xbf16, #tpu.memory_space<vmem>>, vector<2x1x128xbf16>,
    %c0_22 = arith.constant 0 : index
    %c17 = arith.constant 17 : index
    %c0_23 = arith.constant 0 : index
    %41 = vector.load %arg11[%c0_22, %c17, %c0_23] : memref<2x18x128xbf16, #tpu.memory_space<vmem>>, vector<2x1x128xbf16>
    tpu.vector_store %arg11[%c0_22, %c17, %c0_23], %39 {strides = array<i32>} : memref<2x18x128xbf16, #tpu.memory_space<vmem>>, vector<2x1x128xbf16>,
    %42 = vector.shape_cast %38 : vector<32x128xbf16> to vector<2x16x128xbf16>
    %c0_24 = arith.constant 0 : index
    %c1 = arith.constant 1 : index
    %c0_25 = arith.constant 0 : index
    %43 = vector.load %arg11[%c0_24, %c1, %c0_25] : memref<2x18x128xbf16, #tpu.memory_space<vmem>>, vector<2x16x128xbf16>
    tpu.vector_store %arg11[%c0_24, %c1, %c0_25], %42 {strides = array<i32>} : memref<2x18x128xbf16, #tpu.memory_space<vmem>>, vector<2x16x128xbf16>,
    %cst_26 = arith.constant 0.000000e+00 : f32
    %44 = vector.broadcast %cst_26 : f32 to vector<32x128xf32>
    %c0_27 = arith.constant 0 : index
    %c0_28 = arith.constant 0 : index
    %c0_29 = arith.constant 0 : index
    %45 = vector.load %arg11[%c0_27, %c0_28, %c0_29] : memref<2x18x128xbf16, #tpu.memory_space<vmem>>, vector<2x16x128xbf16>
    %46 = vector.shape_cast %45 : vector<2x16x128xbf16> to vector<32x128xbf16>
    %c0_30 = arith.constant 0 : index
    %c0_31 = arith.constant 0 : index
    %c0_32 = arith.constant 0 : index
    %47 = vector.load %arg5[%c0_30, %c0_31, %c0_32] : memref<3x128x128xbf16, #tpu.memory_space<vmem>>, vector<1x128x128xbf16>
    %48 = vector.shape_cast %47 : vector<1x128x128xbf16> to vector<128x128xbf16>
    %cst_33 = arith.constant dense<0.000000e+00> : vector<32x128xf32>
    %49 = tpu.matmul %46, %48, %cst_33 {dimension_numbers = #tpu.dot_dimension_numbers<[1], [0], [0], [1], [0, 0, 1, 1], [], []>} : vector<32x128xbf16>, vector<128x128xbf16>, vector<32x128xf32> -> vector<32x128xf32>
    %50 = arith.addf %44, %49 : vector<32x128xf32>
    %c0_34 = arith.constant 0 : index
    %c1_35 = arith.constant 1 : index
    %c0_36 = arith.constant 0 : index
    %51 = vector.load %arg11[%c0_34, %c1_35, %c0_36] : memref<2x18x128xbf16, #tpu.memory_space<vmem>>, vector<2x16x128xbf16>
    %52 = vector.shape_cast %51 : vector<2x16x128xbf16> to vector<32x128xbf16>
    %c1_37 = arith.constant 1 : index
    %c0_38 = arith.constant 0 : index
    %c0_39 = arith.constant 0 : index
    %53 = vector.load %arg5[%c1_37, %c0_38, %c0_39] : memref<3x128x128xbf16, #tpu.memory_space<vmem>>, vector<1x128x128xbf16>
    %54 = vector.shape_cast %53 : vector<1x128x128xbf16> to vector<128x128xbf16>
    %cst_40 = arith.constant dense<0.000000e+00> : vector<32x128xf32>
    %55 = tpu.matmul %52, %54, %cst_40 {dimension_numbers = #tpu.dot_dimension_numbers<[1], [0], [0], [1], [0, 0, 1, 1], [], []>} : vector<32x128xbf16>, vector<128x128xbf16>, vector<32x128xf32> -> vector<32x128xf32>
    %56 = arith.addf %50, %55 : vector<32x128xf32>
    %c0_41 = arith.constant 0 : index
    %c2 = arith.constant 2 : index
    %c0_42 = arith.constant 0 : index
    %57 = vector.load %arg11[%c0_41, %c2, %c0_42] : memref<2x18x128xbf16, #tpu.memory_space<vmem>>, vector<2x16x128xbf16>
    %58 = vector.shape_cast %57 : vector<2x16x128xbf16> to vector<32x128xbf16>
    %c2_43 = arith.constant 2 : index
    %c0_44 = arith.constant 0 : index
    %c0_45 = arith.constant 0 : index
    %59 = vector.load %arg5[%c2_43, %c0_44, %c0_45] : memref<3x128x128xbf16, #tpu.memory_space<vmem>>, vector<1x128x128xbf16>
    %60 = vector.shape_cast %59 : vector<1x128x128xbf16> to vector<128x128xbf16>
    %cst_46 = arith.constant dense<0.000000e+00> : vector<32x128xf32>
    %61 = tpu.matmul %58, %60, %cst_46 {dimension_numbers = #tpu.dot_dimension_numbers<[1], [0], [0], [1], [0, 0, 1, 1], [], []>} : vector<32x128xbf16>, vector<128x128xbf16>, vector<32x128xf32> -> vector<32x128xf32>
    %62 = arith.addf %56, %61 : vector<32x128xf32>
    %c0_47 = arith.constant 0 : index
    %c0_48 = arith.constant 0 : index
    %63 = vector.load %arg6[%c0_47, %c0_48] : memref<1x128xf32, #tpu.memory_space<vmem>>, vector<1x128xf32>
    %c0_49 = arith.constant 0 : index
    %c0_50 = arith.constant 0 : index
    %64 = vector.load %arg7[%c0_49, %c0_50] : memref<1x128xf32, #tpu.memory_space<vmem>>, vector<1x128xf32>
    %cst_51 = arith.constant dense<0.000000e+00> : vector<128xf32>
    %65 = vector.multi_reduction <add>, %62, %cst_51 [0] : vector<32x128xf32> to vector<128xf32>
    %66 = vector.shape_cast %65 : vector<128xf32> to vector<1x128xf32>
    %67 = arith.mulf %62, %62 : vector<32x128xf32>
    %cst_52 = arith.constant dense<0.000000e+00> : vector<128xf32>
    %68 = vector.multi_reduction <add>, %67, %cst_52 [0] : vector<32x128xf32> to vector<128xf32>
    %69 = vector.shape_cast %68 : vector<128xf32> to vector<1x128xf32>
    %cst_53 = arith.constant 3.125000e-02 : f32
    %70 = vector.broadcast %cst_53 : f32 to vector<1x128xf32>
    %71 = arith.mulf %66, %70 : vector<1x128xf32>
    %cst_54 = arith.constant 3.125000e-02 : f32
    %72 = vector.broadcast %cst_54 : f32 to vector<1x128xf32>
    %73 = arith.mulf %69, %72 : vector<1x128xf32>
    %74 = arith.mulf %71, %71 : vector<1x128xf32>
    %75 = arith.subf %73, %74 : vector<1x128xf32>
    %cst_55 = arith.constant 0.000000e+00 : f32
    %76 = vector.broadcast %cst_55 : f32 to vector<1x128xf32>
    %77 = arith.maximumf %75, %76 : vector<1x128xf32>
    %cst_56 = arith.constant 9.99999974E-6 : f32
    %78 = vector.broadcast %cst_56 : f32 to vector<1x128xf32>
    %79 = arith.addf %77, %78 : vector<1x128xf32>
    %80 = math.rsqrt %79 : vector<1x128xf32>
    %81 = arith.mulf %63, %80 : vector<1x128xf32>
    %82 = arith.mulf %71, %81 : vector<1x128xf32>
    %83 = arith.subf %64, %82 : vector<1x128xf32>
    %84 = vector.broadcast %81 : vector<1x128xf32> to vector<32x128xf32>
    %85 = arith.mulf %62, %84 : vector<32x128xf32>
    %86 = vector.broadcast %83 : vector<1x128xf32> to vector<32x128xf32>
    %87 = arith.addf %85, %86 : vector<32x128xf32>
    %c0_57 = arith.constant 0 : index
    %c0_58 = arith.constant 0 : index
    %88 = vector.load %arg8[%c0_57, %c0_58] : memref<1x128xf32, #tpu.memory_space<vmem>>, vector<1x128xf32>
    %c0_59 = arith.constant 0 : index
    %c0_60 = arith.constant 0 : index
    %89 = vector.load %arg9[%c0_59, %c0_60] : memref<1x128xf32, #tpu.memory_space<vmem>>, vector<1x128xf32>
    %cst_61 = arith.constant dense<0.000000e+00> : vector<128xf32>
    %90 = vector.multi_reduction <add>, %10, %cst_61 [0] : vector<32x128xf32> to vector<128xf32>
    %91 = vector.shape_cast %90 : vector<128xf32> to vector<1x128xf32>
    %92 = arith.mulf %10, %10 : vector<32x128xf32>
    %cst_62 = arith.constant dense<0.000000e+00> : vector<128xf32>
    %93 = vector.multi_reduction <add>, %92, %cst_62 [0] : vector<32x128xf32> to vector<128xf32>
    %94 = vector.shape_cast %93 : vector<128xf32> to vector<1x128xf32>
    %cst_63 = arith.constant 3.125000e-02 : f32
    %95 = vector.broadcast %cst_63 : f32 to vector<1x128xf32>
    %96 = arith.mulf %91, %95 : vector<1x128xf32>
    %cst_64 = arith.constant 3.125000e-02 : f32
    %97 = vector.broadcast %cst_64 : f32 to vector<1x128xf32>
    %98 = arith.mulf %94, %97 : vector<1x128xf32>
    %99 = arith.mulf %96, %96 : vector<1x128xf32>
    %100 = arith.subf %98, %99 : vector<1x128xf32>
    %cst_65 = arith.constant 0.000000e+00 : f32
    %101 = vector.broadcast %cst_65 : f32 to vector<1x128xf32>
    %102 = arith.maximumf %100, %101 : vector<1x128xf32>
    %cst_66 = arith.constant 9.99999974E-6 : f32
    %103 = vector.broadcast %cst_66 : f32 to vector<1x128xf32>
    %104 = arith.addf %102, %103 : vector<1x128xf32>
    %105 = math.rsqrt %104 : vector<1x128xf32>
    %106 = arith.mulf %88, %105 : vector<1x128xf32>
    %107 = arith.mulf %96, %106 : vector<1x128xf32>
    %108 = arith.subf %89, %107 : vector<1x128xf32>
    %109 = vector.broadcast %106 : vector<1x128xf32> to vector<32x128xf32>
    %110 = arith.mulf %10, %109 : vector<32x128xf32>
    %111 = vector.broadcast %108 : vector<1x128xf32> to vector<32x128xf32>
    %112 = arith.addf %110, %111 : vector<32x128xf32>
    %113 = arith.addf %87, %112 : vector<32x128xf32>
    %cst_67 = arith.constant 0.000000e+00 : f32
    %114 = vector.broadcast %cst_67 : f32 to vector<32x128xf32>
    %115 = arith.maximumf %113, %114 : vector<32x128xf32>
    %c0_68 = arith.constant 0 : index
    %c0_69 = arith.constant 0 : index
    %116 = vector.load %arg10[%c0_68, %c0_69] : memref<32x128xf32, #tpu.memory_space<vmem>>, vector<32x128xf32>
    tpu.vector_store %arg10[%c0_68, %c0_69], %115 {strides = array<i32>} : memref<32x128xf32, #tpu.memory_space<vmem>>, vector<32x128xf32>,
    return
  }
}

</mosaic_0001>

<bundles_post_ra>
// kernel: basic_block_1d.1
= control target key start
LH: loop header
LB: loop body
LE: loop exit
PB: predicated region body
PF: predicated region fallthrough
CT: control target
= control target key end

     0   :  { %vm60_vm0 = vsmask.f32 7424  ;;  %vm87_vm1 = vcmask 1046528   ;;  %vm559_vm2 = vcmask 1040384   ;;  %vm560_vm3 = vsmask.f32 256  ;;  %s1946_s1 = inlined_call_operand.vmem [shape: bf16[384,128], index: 1, kind: input, shape index: {}]   ;;  %s1947_s0 = inlined_call_operand.vmem [shape: bf16[2,18,128], index: 0, kind: input, shape index: {}]   ;;  %s1948_s5 = inlined_call_operand.vmem [shape: bf16[3,128,128], index: 5, kind: input, shape index: {}]   ;;  %s1949_s2 = inlined_call_operand.vmem [shape: bf16[128,128], index: 2, kind: input, shape index: {}]   ;;  %s1950_s3 = inlined_call_operand.vmem [shape: f32[1,128], index: 3, kind: input, shape index: {}]   ;;  %s1951_s4 = inlined_call_operand.vmem [shape: f32[1,128], index: 4, kind: input, shape index: {}]   ;;  %s1952_s8 = inlined_call_operand.vmem [shape: f32[1,128], index: 8, kind: input, shape index: {}]   ;;  %s1953_s9 = inlined_call_operand.vmem [shape: f32[1,128], index: 9, kind: input, shape index: {}]   ;;  %s1954_s6 = inlined_call_operand.vmem [shape: f32[1,128], index: 6, kind: input, shape index: {}]   ;;  %s1955_s7 = inlined_call_operand.vmem [shape: f32[1,128], index: 7, kind: input, shape index: {}]   ;;  %s1956_s10 = inlined_call_operand.vmem [shape: f32[32,128], index: 10, kind: output, shape index: {}]  }
   0x1   :  { %v1515_v0 = vld [vmem:[%s1946_s1 + $0x40] sm:$0xff]   ;;  %v1517_v2 = vld [vmem:[%s1946_s1 + $0x48] sm:$0xff]   ;;  %v1519_v4 = vld [vmem:[%s1946_s1 + $0x50] sm:$0xff]   ;;  %vm568_vm5 = vsmask.f32 7938  ;;  %vm628_vm8 = vcmask 1043456  }
   0x2   :  { %v1516_v1 = vld [vmem:[%s1946_s1] sm:$0xff]   ;;  %1329 = vmatprep.subr.bf16.mxu0 %v1515_v0  ;;  %v1518_v3 = vld [vmem:[%s1946_s1 + $0x8] sm:$0xff]   ;;  %v1520_v5 = vld [vmem:[%s1946_s1 + $0x10] sm:$0xff]   ;;  %vm586_vm7 = vsmask.f32 4368  ;;  %vm954_vm14 = vcmask 1042432  }
   0x3   :  { %1330 = vmatpush3.bf16.msra.mxu0 %v1516_v1  ;;  %v1521_v6 = vld [vmem:[%s1946_s1 + $0x58] sm:$0xff]   ;;  %v1523_v8 = vld [vmem:[%s1946_s1 + $0x60] sm:$0xff]   ;;  %v1525_v10 = vld [vmem:[%s1946_s1 + $0x68] sm:$0xff]   ;;  %vm666_vm11 = vsmask.f32 3328  ;;  %vm955_vm15 = vcmask 1046532  }
   0x4   :  { %1331 = vmatprep.subr.bf16.mxu0 %v1517_v2  ;;  %v1522_v7 = vld [vmem:[%s1946_s1 + $0x18] sm:$0xff]   ;;  %v1524_v9 = vld [vmem:[%s1946_s1 + $0x20] sm:$0xff]   ;;  %v1532_v12 = vld [vmem:[%s1947_s0 + $0x8] ss:$0 sps:$4 sm:$0x11]  }
   0x5   :  { %v1531_v11 = vld [vmem:[%s1947_s0] sm:$0xff]   ;;  %v1526_v13 = vld [vmem:[%s1946_s1 + $0x28] sm:$0xff]   ;;  %v69_v16 = vshll.u32 %v1532_v12, 16  ;;  %v1527_v17 = vld [vmem:[%s1946_s1 + $0x70] sm:$0xff]   ;;  %v89_v38 = vrot.slane %v1532_v12, 1 }
   0x6   :  { %v62_v14 = vshrl.u32 %v1531_v11, 16  ;;  %v64_v15 = vshll.u32 %v1531_v11, 16  ;;  %v1528_v20 = vld [vmem:[%s1946_s1 + $0x30] sm:$0xff]   ;;  %v1529_v21 = vld [vmem:[%s1946_s1 + $0x78] sm:$0xff]   ;;  %v1533_v30 = vld [vmem:[%s1946_s1 + $0x80] sm:$0xff]   ;;  %v88_v37 = vrot.slane %v1531_v11, 1 }
   0x7   :  { %1332 = vmatpush3.bf16.msra.mxu0 %v1518_v3  ;;  %v71_v19 = vrot.slane %v69_v16, 1  ;;  %v1538_v23 = vld [vmem:[%s1947_s0 + $0xc] sm:$0xff]   ;;  %v1539_v24 = vld [vmem:[%s1947_s0 + $0x14] ss:$0 sps:$4 sm:$0x11]   ;;  %v1530_v26 = vld [vmem:[%s1946_s1 + $0x38] sm:$0xff]  }
   0x8   :  { %1333 = vmatprep.subr.bf16.mxu0 %v1519_v4  ;;  %v66_v18 = vrot.slane %v64_v15, 1  ;;  %v74_v27 = vshrl.u32 %v1538_v23, 16  ;;  %v76_v28 = vshll.u32 %v1538_v23, 16  ;;  %v81_v29 = vshll.u32 %v1539_v24, 16  ;;  %v1534_v34 = vld [vmem:[%s1946_s1 + $0x88] sm:$0xff]   ;;  %v1535_v36 = vld [vmem:[%s1946_s1 + $0x90] sm:$0xff]   ;;  %vm1733_vm4 = vmand %vm559_vm2, %vm560_vm3 }
   0x9   :  { %v1536_v39 = vld [vmem:[%s1946_s1 + $0x98] sm:$0xff]   ;;  %v90_v40 = vsel %vm87_vm1, %v88_v37, %v89_v38  ;;  %v1537_v41 = vld [vmem:[%s1946_s1 + $0xa0] sm:$0xff]   ;;  %v1540_v42 = vld [vmem:[%s1946_s1 + $0xa8] sm:$0xff]   ;;  %v91_v45 = vrot.slane %v1538_v23, 1  ;;  %v92_v46 = vrot.slane %v1539_v24, 1 }
   0xa   :  { %v67_v22 = vor.u32 %v66_v18, %v62_v14  ;;  %v78_v31 = vrot.slane %v76_v28, 1  ;;  %v83_v32 = vrot.slane %v81_v29, 1  ;;  %v1541_v43 = vld [vmem:[%s1946_s1 + $0xb0] sm:$0xff]   ;;  %v1542_v44 = vld [vmem:[%s1946_s1 + $0xb8] sm:$0xff]   ;;  %v1543_v48 = vld [vmem:[%s1948_s5 + $0x40] sm:$0xff]  }
   0xb   :  { %1334 = vmatpush3.bf16.msra.mxu0 %v1520_v5  ;;  %v93_v47 = vsel %vm87_vm1, %v91_v45, %v92_v46  ;;  %1447 = vmatprep.subr.bf16.mxu1 %v1543_v48  ;;  %v562_v49 = vld [vmem:[#allocation2] sm:$0x1]  ;;  %v565_v51 = vld [vmem:[#allocation2 + $0xc] sm:$0x1]  ;;  %v570_v52 = vld [vmem:[#allocation2 + $0x8] sm:$0x1] }
   0xc   :  { %1335 = vmatprep.subr.bf16.mxu0 %v1521_v6  ;;  %v72_v25 = vsel %vm60_vm0, %v67_v22, %v71_v19  ;;  %v79_v33 = vor.u32 %v78_v31, %v74_v27  ;;  %1448 = vmatpush3.bf16.msra.mxu1 %v1543_v48  ;;  %v563_v53 = vsel %vm1733_vm4, 0, %v562_v49  ;;  %v566_v54 = vsel %vm1733_vm4, 0, %v565_v51  ;;  %vm569_vm6 = vmand %vm559_vm2, %vm568_vm5  ;;  %v573_v55 = vld [vmem:[#allocation2 + $0x14] sm:$0x1]  ;;  %v1544_v58 = vld [vmem:[%s1948_s5 + $0x48] sm:$0xff]  }
   0xd   :  { %320 = vmatprep.mubr.bf16.mxu0 %v72_v25  ;;  %564 = vst [vmem:[#allocation2] sm:$0x1] %v563_v53  ;;  %567 = vst [vmem:[#allocation2 + $0xc] sm:$0x1] %v566_v54  ;;  %v571_v56 = vsel %vm569_vm6, 0, %v570_v52  ;;  %v574_v57 = vsel %vm569_vm6, 0, %v573_v55  ;;  %1449 = vmatprep.subr.bf16.mxu1 %v1544_v58 }
   0xe   :  { %v1706_v35 = vsel %vm60_vm0, %v79_v33, %v83_v32  ;;  %572 = vst [vmem:[#allocation2 + $0x8] sm:$0x1] %v571_v56  ;;  %575 = vst [vmem:[#allocation2 + $0x14] sm:$0x1] %v574_v57  ;;  %v1545_v59 = vld [vmem:[%s1948_s5 + $0x50] sm:$0xff]   ;;  %v1546_v60 = vld [vmem:[%s1948_s5 + $0x58] sm:$0xff]  }
   0xf   :  { %1336 = vmatpush3.bf16.msra.mxu0 %v1522_v7  ;;  %v1548_v61 = vld [vmem:[%s1948_s5 + $0x60] sm:$0xff]   ;;  %v1549_v63 = vld [vmem:[%s1949_s2 + $0x8] sm:$0xff]   ;;  %v1551_v1 = vld [vmem:[%s1949_s2 + $0x10] sm:$0xff]   ;;  %vm667_vm12 = vsmask.f32 7440 }
  0x10   :  { %1337 = vmatprep.subr.bf16.mxu0 %v1523_v8  ;;  %1450 = vmatpush3.bf16.msra.mxu1 %v1544_v58  ;;  %v1547_v62 = vld [vmem:[%s1949_s2] sm:$0xff]   ;;  %v1550_v0 = vld [vmem:[%s1948_s5 + $0x68] sm:$0xff]   ;;  %v1552_v2 = vld [vmem:[%s1948_s5 + $0x70] sm:$0xff]  }
  0x11   :  { %1451 = vmatprep.subr.bf16.mxu1 %v1545_v59  ;;  %v1553_v3 = vld [vmem:[%s1949_s2 + $0x18] sm:$0xff]   ;;  %v1555_v5 = vld [vmem:[%s1949_s2 + $0x20] sm:$0xff]   ;;  %v1558_v7 = vld [vmem:[%s1949_s2 + $0x28] sm:$0xff]  }
  0x12   :  { %v1554_v4 = vld [vmem:[%s1948_s5 + $0x78] sm:$0xff]   ;;  %v1781_v6 = vld [vmem:[%s1948_s5] sm:$0xff]   ;;  %v1560_v8 = vld [vmem:[%s1949_s2 + $0x30] sm:$0xff]  }
  0x13   :  { %1338 = vmatpush3.bf16.msra.mxu0 %v1524_v9  ;;  %vm1805_vm9 = vmor %vm560_vm3, %vm586_vm7 }
  0x14   :  { %1339 = vmatprep.subr.bf16.mxu0 %v1525_v10  ;;  %1452 = vmatpush3.bf16.msra.mxu1 %v1545_v59  ;;  %v534_v59 = vlaneseq  ;;  %vm1810_vm10 = vmand %vm628_vm8, %vm568_vm5 }
  0x15   :  { %1453 = vmatprep.subr.bf16.mxu1 %v1546_v60  ;;  %vm1842_vm13 = vmor %vm666_vm11, %vm667_vm12 }
  0x16   :  { %vm1853_vm0 = vmor %vm954_vm14, %vm955_vm15 }
  0x17   :  { %1340 = vmatpush3.bf16.msra.mxu0 %v1526_v13  ;;  %v1562_v13 = vld [vmem:[%s1949_s2 + $0x38] sm:$0xff]  }
  0x18   :  { %1341 = vmatprep.subr.bf16.mxu0 %v1527_v17  ;;  %1454 = vmatpush3.bf16.msra.mxu1 %v1546_v60  ;;  %v535_v60 = vshrl.u32 %v534_v59, 7 }
  0x19   :  { %1455 = vmatprep.subr.bf16.mxu1 %v1548_v61 }
  0x1b   :  { %1342 = vmatpush3.bf16.msra.mxu0 %v1528_v20 }
  0x1c   :  { %1343 = vmatprep.subr.bf16.mxu0 %v1529_v21  ;;  %1456 = vmatpush3.bf16.msra.mxu1 %v1548_v61  ;;  %v499_v61 = vld [vmem:[%s1950_s3] sm:$0x1] }
  0x1d   :  { %1457 = vmatprep.subr.bf16.mxu1 %v1550_v0 }
  0x1f   :  { %1344 = vmatpush3.bf16.msra.mxu0 %v1530_v26 }
  0x20   :  { %1407 = vmatprep.subr.bf16.mxu0 %v1533_v30  ;;  %1458 = vmatpush3.bf16.msra.mxu1 %v1550_v0 }
  0x21   :  { %1459 = vmatprep.subr.bf16.mxu1 %v1552_v2 }
  0x22   :  { %321 = vmatmul.mubr.bf16.vlgmr.msra.gmra.mrb[0].mxu0 %v1531_v11 }
  0x23   :  { %1408 = vmatpush3.bf16.msra.mxu0 %v1533_v30  ;;  %328 = vmatprep.mubr.bf16.mxu0 %v1706_v35 }
  0x24   :  { %1409 = vmatprep.subr.bf16.mxu0 %v1534_v34  ;;  %1460 = vmatpush3.bf16.msra.mxu1 %v1552_v2 }
  0x25   :  { %1461 = vmatprep.subr.bf16.mxu1 %v1554_v4 }
  0x27   :  { %1410 = vmatpush3.bf16.msra.mxu0 %v1534_v34 }
  0x28   :  { %1411 = vmatprep.subr.bf16.mxu0 %v1535_v36  ;;  %1462 = vmatpush3.bf16.msra.mxu1 %v1554_v4 }
  0x29   :  { %1467 = vmatprep.subr.bf16.mxu1 %v1781_v6 }
  0x2a   :  { %329 = vmatmul.mubr.bf16.gmra.mrb[4].mxu0 %v1538_v23 }
  0x2b   :  { %1412 = vmatpush3.bf16.msra.mxu0 %v1535_v36  ;;  %1423 = vmatprep.mubr.bf16.mxu0 %v90_v40 }
  0x2c   :  { %1413 = vmatprep.subr.bf16.mxu0 %v1536_v39 }
  0x2f   :  { %1414 = vmatpush3.bf16.msra.mxu0 %v1536_v39 }
  0x30   :  { %1415 = vmatprep.subr.bf16.mxu0 %v1537_v41 }
  0x33   :  { %1416 = vmatpush3.bf16.msra.mxu0 %v1537_v41 }
  0x34   :  { %1417 = vmatprep.subr.bf16.mxu0 %v1540_v42 }
  0x37   :  { %1418 = vmatpush3.bf16.msra.mxu0 %v1540_v42 }
  0x38   :  { %1419 = vmatprep.subr.bf16.mxu0 %v1541_v43 }
  0x3b   :  { %1420 = vmatpush3.bf16.msra.mxu0 %v1541_v43 }
  0x3c   :  { %1421 = vmatprep.subr.bf16.mxu0 %v1542_v44 }
  0x3f   :  { %1422 = vmatpush3.bf16.msra.mxu0 %v1542_v44 }
  0x40   :  { %1427 = vmatprep.subr.bf16.mxu0 %v1547_v62 }
  0x42   :  { %1424 = vmatmul.mubr.bf16.vlgmr.msra.gmra.mrb[8].mxu0 %v93_v47 }
  0x43   :  { %1443 = vmatprep.mubr.bf16.mxu0 %v72_v25  ;;  %1428 = vmatpush3.bf16.msra.mxu0 %v1547_v62  ;;  %v1797_v62 = vsub.s32 0, %v535_v60 }
  0x44   :  { %1429 = vmatprep.subr.bf16.mxu0 %v1549_v63 }
  0x47   :  { %1430 = vmatpush3.bf16.msra.mxu0 %v1549_v63 }
  0x48   :  { %1431 = vmatprep.subr.bf16.mxu0 %v1551_v1 }
  0x4b   :  { %1432 = vmatpush3.bf16.msra.mxu0 %v1551_v1  ;;  %v500_v1 = vld [vmem:[%s1951_s4] sm:$0x1] }
  0x4c   :  { %1433 = vmatprep.subr.bf16.mxu0 %v1553_v3 }
  0x4f   :  { %1434 = vmatpush3.bf16.msra.mxu0 %v1553_v3 }
  0x50   :  { %1435 = vmatprep.subr.bf16.mxu0 %v1555_v5 }
  0x53   :  { %1436 = vmatpush3.bf16.msra.mxu0 %v1555_v5 }
  0x54   :  { %1437 = vmatprep.subr.bf16.mxu0 %v1558_v7 }
  0x57   :  { %1438 = vmatpush3.bf16.msra.mxu0 %v1558_v7 }
  0x58   :  { %1439 = vmatprep.subr.bf16.mxu0 %v1560_v8 }
  0x5b   :  { %1440 = vmatpush3.bf16.msra.mxu0 %v1560_v8 }
  0x5c   :  { %1441 = vmatprep.subr.bf16.mxu0 %v1562_v13 }
  0x5f   :  { %1442 = vmatpush3.bf16.msra.mxu0 %v1562_v13 }
  0x62   :  { %1444 = vmatmul.mubr.bf16.vlgmr.msra.gmra.mrb[12].mxu0 %v1706_v35 }
  0xf5   :  { %v1345_v9 = vpop.f32.mrb[0].mxu0 }
  0xf6   :  { %v1346_v10 = vpop.f32.mrb[1].mxu0 }
  0xf7   :  { %v1347_v11 = vadd.f32 %v1346_v10, %v1345_v9  ;;  %v1348_v12 = vpop.f32.mrb[2].mxu0 }
  0xf8   :  { %v1349_v14 = vpop.f32.mrb[3].mxu0 }
  0xf9   :  { %v1350_v15 = vadd.f32 %v1349_v14, %v1348_v12 }
  0xfd   :  { %v1351_v16 = vpop.f32.mrb[4].mxu0 }
  0xfe   :  { %v1352_v17 = vpop.f32.mrb[5].mxu0 }
  0xff   :  { %v1353_v18 = vadd.f32 %v1352_v17, %v1351_v16  ;;  %v1354_v19 = vpop.f32.mrb[6].mxu0 }
 0x100   :  { %v1355_v20 = vpop.f32.mrb[7].mxu0 }
 0x101   :  { %v1356_v21 = vadd.f32 %v1355_v20, %v1354_v19 }
 0x115   :  { %v1425_v22 = vpop.f32.mrb[8].mxu0 }
 0x116   :  { %v380_v23 = vadd.f32 %v1425_v22, %v1353_v18  ;;  %v371_v24 = vpop.f32.mrb[9].mxu0 }
 0x117   :  { %v372_v25 = vadd.f32 %v1347_v11, %v371_v24  ;;  %v1426_v26 = vpop.f32.mrb[10].mxu0 }
 0x118   :  { %v383_v27 = vadd.f32 %v1426_v26, %v1356_v21  ;;  %v374_v28 = vpop.f32.mrb[11].mxu0  ;;  %v512_v33 = vmul.f32 %v380_v23, %v380_v23 }
 0x119   :  { %v375_v29 = vadd.f32 %v1350_v15, %v374_v28  ;;  %v510_v30 = vmul.f32 %v372_v25, %v372_v25 }
 0x11a   :  { %v513_v35 = vmul.f32 %v383_v27, %v383_v27 }
 0x11b   :  { %v501_v31 = vadd.f32 %v375_v29, %v372_v25  ;;  %v511_v32 = vmul.f32 %v375_v29, %v375_v29 }
 0x11d   :  { %v502_v34 = vadd.f32 %v501_v31, %v380_v23  ;;  %v514_v36 = vadd.f32 %v511_v32, %v510_v30  ;;  %v630_v32 = vld [vmem:[#allocation2] sm:$0xf] }
 0x11f   :  { %v503_v37 = vadd.f32 %v502_v34, %v383_v27  ;;  %v515_v38 = vadd.f32 %v514_v36, %v512_v33 }
 0x121   :  { %v504_v39 = vrot.slane %v503_v37, 4  ;;  %v516_v40 = vadd.f32 %v515_v38, %v513_v35  ;;  %v634_v38 = vld [vmem:[#allocation2 + $0x8] sm:$0x1] }
 0x123   :  { %v505_v41 = vadd.f32 %v504_v39, %v503_v37  ;;  %v517_v42 = vrot.slane %v516_v40, 4 }
 0x125   :  { %v506_v43 = vrot.slane %v505_v41, 2  ;;  %v518_v44 = vadd.f32 %v517_v42, %v516_v40 }
 0x127   :  { %v507_v45 = vadd.f32 %v506_v43, %v505_v41  ;;  %v519_v46 = vrot.slane %v518_v44, 2  ;;  %v637_v43 = vld [vmem:[#allocation2 + $0xc] sm:$0xf] }
 0x129   :  { %v508_v47 = vrot.slane %v507_v45, 1  ;;  %v520_v48 = vadd.f32 %v519_v46, %v518_v44  ;;  %v641_v44 = vld [vmem:[#allocation2 + $0x14] sm:$0x1] }
 0x12b   :  { %v509_v49 = vadd.f32 %v508_v47, %v507_v45  ;;  %v521_v51 = vrot.slane %v520_v48, 1 }
 0x12d   :  { %v522_v52 = vadd.f32 %v521_v51, %v520_v48  ;;  %v523_v53 = vmul.f32 0.03125, %v509_v49 }
 0x12f   :  { %v524_v54 = vmul.f32 0.03125, %v522_v52  ;;  %v525_v55 = vmul.f32 %v523_v53, %v523_v53 }
 0x131   :  { %v526_v56 = vsub.f32 %v524_v54, %v525_v55 }
 0x133   :  { %v527_v57 = vmax.f32 %v526_v56, 0.0 }
 0x135   :  { %v528_v58 = vadd.f32 1e-05, %v527_v57 }
 0x137   :  { %1577 = vrsqrt.f32 %v528_v58 }
 0x141   :  { %v1578_v63 = vpop.eup %1577 }
 0x142   :  { %v530_v0 = vmul.f32 %v1578_v63, %v499_v61 }
 0x144   :  { %v531_v2 = vmul.f32 %v530_v0, %v523_v53  ;;  %v537_v3 = vrot.slane %v530_v0, %v1797_v62 }
 0x146   :  { %v532_v4 = vsub.f32 %v500_v1, %v531_v2  ;;  %v539_v5 = vmul.f32 %v537_v3, %v372_v25  ;;  %v540_v7 = vmul.f32 %v537_v3, %v375_v29  ;;  %v541_v8 = vmul.f32 %v537_v3, %v380_v23 }
 0x147   :  { %v542_v9 = vmul.f32 %v537_v3, %v383_v27 }
 0x148   :  { %v547_v10 = vrot.slane %v532_v4, %v1797_v62 }
 0x14a   :  { %v549_v11 = vadd.f32 %v547_v10, %v539_v5  ;;  %v550_v12 = vadd.f32 %v547_v10, %v540_v7  ;;  %v551_v13 = vadd.f32 %v547_v10, %v541_v8  ;;  %v552_v14 = vadd.f32 %v547_v10, %v542_v9 }
 0x14c   :  { %v553_v15 = vmax.f32 %v549_v11, 0.0  ;;  %v554_v16 = vmax.f32 %v550_v12, 0.0  ;;  %v555_v17 = vmax.f32 %v551_v13, 0.0  ;;  %v556_v18 = vmax.f32 %v552_v14, 0.0 }
 0x14e   :  { %v1325_v19 = vpack.c.bf16 %v553_v15, %v553_v15  ;;  %v1326_v20 = vpack.c.bf16 %v554_v16, %v554_v16  ;;  %v1327_v21 = vpack.c.bf16 %v555_v17, %v555_v17  ;;  %v1328_v22 = vpack.c.bf16 %v556_v18, %v556_v18 }
 0x150   :  { %v589_v24 = vshrl.u32 %v1325_v19, 16  ;;  %v597_v25 = vshrl.u32 %v1326_v20, 16  ;;  %v606_v23 = vshrl.u32 %v1327_v21, 16  ;;  %v614_v26 = vshrl.u32 %v1328_v22, 16 }
 0x151   :  { %v592_v29 = vshll.u32 %v1325_v19, 16  ;;  %v600_v31 = vshll.u32 %v1326_v20, 16  ;;  %v609_v34 = vshll.u32 %v1327_v21, 16  ;;  %v617_v35 = vshll.u32 %v1328_v22, 16 }
 0x152   :  { %v591_v28 = vrot.slane %v589_v24, 7  ;;  %v599_v30 = vrot.slane %v597_v25, 7  ;;  %v608_v33 = vrot.slane %v606_v23, 7  ;;  %v616_v36 = vrot.slane %v614_v26, 7 }
 0x154   :  { %v594_v39 = vor.u32 %v592_v29, %v591_v28  ;;  %v595_v40 = vrot.slane %v591_v28, 4  ;;  %v602_v41 = vor.u32 %v600_v31, %v599_v30  ;;  %v604_v42 = vrot.slane %v599_v30, 4 }
 0x155   :  { %v611_v45 = vor.u32 %v609_v34, %v608_v33  ;;  %v612_v46 = vrot.slane %v608_v33, 4  ;;  %v619_v47 = vor.u32 %v617_v35, %v616_v36  ;;  %v621_v48 = vrot.slane %v616_v36, 4 }
 0x156   :  { %v603_v49 = vsel %vm1805_vm9, %v595_v40, %v602_v41  ;;  %v631_v51 = vsel %vm1810_vm10, %v594_v39, %v630_v32  ;;  %v635_v52 = vsel %vm1733_vm4, %v604_v42, %v634_v38  ;;  %v1559_v40 = vld [vmem:[%s1948_s5 + $0x8] sm:$0xff]  }
 0x157   :  { %v620_v53 = vsel %vm1805_vm9, %v612_v46, %v619_v47  ;;  %632 = vst [vmem:[#allocation2] sm:$0xf] %v631_v51  ;;  %633 = vst [vmem:[#allocation2 + $0x4] sm:$0xf] %v603_v49  ;;  %v638_v54 = vsel %vm1810_vm10, %v611_v45, %v637_v43  ;;  %v642_v55 = vsel %vm1733_vm4, %v621_v48, %v641_v44  ;;  %v1561_v45 = vld [vmem:[%s1948_s5 + $0x10] sm:$0xff]   ;;  %v1563_v46 = vld [vmem:[%s1948_s5 + $0x18] sm:$0xff]  }
 0x158   :  { %636 = vst [vmem:[#allocation2 + $0x8] sm:$0x1] %v635_v52  ;;  %639 = vst [vmem:[#allocation2 + $0xc] sm:$0xf] %v638_v54  ;;  %v1564_v47 = vld [vmem:[%s1948_s5 + $0x20] sm:$0xff]   ;;  %v1566_v48 = vld [vmem:[%s1948_s5 + $0x30] sm:$0xff]  }
 0x159   :  { %640 = vst [vmem:[#allocation2 + $0x10] sm:$0xf] %v620_v53  ;;  %643 = vst [vmem:[#allocation2 + $0x14] sm:$0x1] %v642_v55  ;;  %v1567_v51 = vld [vmem:[%s1948_s5 + $0x38] sm:$0xff]   ;;  %v1569_v55 = vld [vmem:[%s1948_s5 + $0x80] sm:$0xff]  }
 0x15e   :  { %v644_v56 = vld [vmem:[#allocation2] sm:$0xf]  ;;  %v1826_v57 = vld [vmem:[#allocation2 + $0x4] sm:$0xf] }
 0x15f   :  { %v1828_v58 = vld [vmem:[#allocation2 + $0x8] sm:$0x1]  ;;  %v670_v59 = vshrl.u32 %v644_v56, 16  ;;  %v673_v60 = vshll.u32 %v644_v56, 16  ;;  %v679_v61 = vshll.u32 %v1826_v57, 16  ;;  %v683_v63 = vshrl.u32 %v1826_v57, 16 }
 0x160   :  { %v1832_v0 = vld [vmem:[#allocation2 + $0xc] sm:$0xf]  ;;  %v689_v50 = vshll.u32 %v1828_v58, 16  ;;  %v1835_v1 = vld [vmem:[#allocation2 + $0x10] sm:$0xf]  ;;  %v1287_v41 = vcombine.low %v644_v56, %v1826_v57  ;;  %v959_v49 = vrot.slane %v1826_v57, 5 }
 0x161   :  { %v672_v2 = vrot.slane %v670_v59, 4  ;;  %v675_v3 = vrot.slane %v673_v60, 5  ;;  %v681_v4 = vrot.slane %v679_v61, 5  ;;  %v685_v5 = vrot.slane %v683_v63, 4  ;;  %v665_v7 = vld [vmem:[#allocation2 + $0x14] sm:$0x1] }
 0x162   :  { %v694_v8 = vshrl.u32 %v1832_v0, 16  ;;  %v697_v9 = vshll.u32 %v1832_v0, 16  ;;  %v703_v10 = vshll.u32 %v1835_v1, 16  ;;  %v707_v13 = vshrl.u32 %v1835_v1, 16  ;;  %v949_v25 = vld [vmem:[#allocation2 + $0xc] sm:$0xe] }
 0x163   :  { %v676_v11 = vor.u32 %v675_v3, %v672_v2  ;;  %v686_v12 = vor.u32 %v685_v5, %v681_v4  ;;  %v691_v15 = vrot.slane %v689_v50, 5  ;;  %v713_v22 = vshll.u32 %v665_v7, 16  ;;  %v948_v52 = vld [vmem:[#allocation2] sm:$0xe]  ;;  %v1571_v63 = vld [vmem:[%s1948_s5 + $0x90] sm:$0xff]   ;;  %v1576_v3 = vld [vmem:[%s1948_s5 + $0xb8] sm:$0xff]  }
 0x164   :  { %v696_v16 = vrot.slane %v694_v8, 4  ;;  %v699_v17 = vrot.slane %v697_v9, 5  ;;  %v705_v18 = vrot.slane %v703_v10, 5  ;;  %v709_v21 = vrot.slane %v707_v13, 4  ;;  %v1573_v50 = vld [vmem:[%s1948_s5 + $0xa0] sm:$0xff]   ;;  %v1575_v2 = vld [vmem:[%s1948_s5 + $0xb0] sm:$0xff]  }
 0x165   :  { %v677_v19 = vrot.slane %v676_v11, 4  ;;  %v687_v20 = vrot.slane %v686_v12, 4  ;;  %v715_v31 = vrot.slane %v713_v22, 5  ;;  %v1298_v32 = vrot.slane %v949_v25, 9 }
 0x166   :  { %v700_v24 = vor.u32 %v699_v17, %v696_v16  ;;  %v710_v27 = vor.u32 %v709_v21, %v705_v18  ;;  %v966_v33 = vrot.slane %v1835_v1, 5  ;;  %v969_v37 = vrot.slane %v665_v7, 5 }
 0x167   :  { %v682_v23 = vsel %vm1842_vm13, %v677_v19, %v681_v4  ;;  %v692_v26 = vsel %vm1842_vm13, %v687_v20, %v691_v15  ;;  %v961_v53 = vrot.slane %v959_v49, 4  ;;  %v962_v54 = vrot.slane %v1828_v58, 5  ;;  %v1570_v58 = vld [vmem:[%s1948_s5 + $0x88] sm:$0xff]   ;;  %v1445_v4 = vpop.f32.mrb[12].mxu0 }
 0x168   :  { %v1277_v28 = vcombine.low %v682_v23, %v692_v26  ;;  %v701_v29 = vrot.slane %v700_v24, 4  ;;  %v711_v30 = vrot.slane %v710_v27, 4  ;;  %v968_v38 = vrot.slane %v966_v33, 4  ;;  %v484_v5 = vpop.f32.mrb[13].mxu0 }
 0x169   :  { %v967_v42 = vsel %vm1853_vm0, %v1298_v32, %v966_v33  ;;  %v1297_v56 = vrot.slane %v948_v52, 9  ;;  %v963_v57 = vsel %vm1853_vm0, %v961_v53, %v962_v54  ;;  %v1288_v59 = vcombine.low %v1832_v0, %v1835_v1  ;;  %v1572_v0 = vld [vmem:[%s1948_s5 + $0x98] sm:$0xff]   ;;  %v1574_v1 = vld [vmem:[%s1948_s5 + $0xa8] sm:$0xff]   ;;  %v1446_v8 = vpop.f32.mrb[14].mxu0 }
 0x16a   :  { %1463 = vmatprep.mubr.bf16.mxu1 %v1277_v28  ;;  %v706_v34 = vsel %vm1842_vm13, %v701_v29, %v705_v18  ;;  %v716_v35 = vsel %vm1842_vm13, %v711_v30, %v715_v31  ;;  %v970_v43 = vsel %vm1853_vm0, %v968_v38, %v969_v37  ;;  %v1162_v7 = vmul.f32 %v484_v5, %v484_v5  ;;  %v487_v9 = vpop.f32.mrb[15].mxu0  ;;  %v1151_v37 = vld [vmem:[%s1952_s8] sm:$0x1] }
 0x16b   :  { %v1278_v39 = vcombine.low %v706_v34, %v716_v35  ;;  %v1316_v44 = vcombine.low %v967_v42, %v970_v43  ;;  %v960_v60 = vsel %vm1853_vm0, %v1297_v56, %v959_v49  ;;  %v1164_v10 = vmul.f32 %v1445_v4, %v1445_v4 }
 0x16c   :  { %v1315_v61 = vcombine.low %v960_v60, %v963_v57  ;;  %v1153_v11 = vadd.f32 %v487_v9, %v484_v5  ;;  %v1163_v12 = vmul.f32 %v487_v9, %v487_v9  ;;  %v1165_v13 = vmul.f32 %v1446_v8, %v1446_v8 }
 0x16d   :  { %1464 = vmatmul.mubr.bf16.vlgmr.msra.gmra.mrb[0].mxu1 %v1278_v39 }
 0x16e   :  { %1468 = vmatpush3.bf16.msra.mxu1 %v1781_v6  ;;  %1483 = vmatprep.mubr.bf16.mxu1 %v1287_v41  ;;  %v1565_v6 = vld [vmem:[%s1948_s5 + $0x28] sm:$0xff]   ;;  %v1154_v14 = vadd.f32 %v1445_v4, %v1153_v11  ;;  %v1166_v15 = vadd.f32 %v1163_v12, %v1162_v7 }
 0x16f   :  { %1469 = vmatprep.subr.bf16.mxu1 %v1559_v40 }
 0x170   :  { %v1155_v16 = vadd.f32 %v1446_v8, %v1154_v14  ;;  %v1167_v17 = vadd.f32 %v1166_v15, %v1164_v10 }
 0x172   :  { %1470 = vmatpush3.bf16.msra.mxu1 %v1559_v40  ;;  %v1156_v18 = vrot.slane %v1155_v16, 4  ;;  %v1168_v19 = vadd.f32 %v1167_v17, %v1165_v13  ;;  %v1152_v40 = vld [vmem:[%s1953_s9] sm:$0x1] }
 0x173   :  { %1471 = vmatprep.subr.bf16.mxu1 %v1561_v45 }
 0x174   :  { %v1157_v20 = vadd.f32 %v1156_v18, %v1155_v16  ;;  %v1169_v21 = vrot.slane %v1168_v19, 4 }
 0x176   :  { %1472 = vmatpush3.bf16.msra.mxu1 %v1561_v45  ;;  %v1158_v22 = vrot.slane %v1157_v20, 2  ;;  %v1170_v24 = vadd.f32 %v1169_v21, %v1168_v19 }
 0x177   :  { %1473 = vmatprep.subr.bf16.mxu1 %v1563_v46 }
 0x178   :  { %v1159_v25 = vadd.f32 %v1158_v22, %v1157_v20  ;;  %v1171_v23 = vrot.slane %v1170_v24, 2  ;;  %v1097_v22 = vld [vmem:[%s1954_s6] sm:$0x1] }
 0x17a   :  { %1474 = vmatpush3.bf16.msra.mxu1 %v1563_v46  ;;  %v1160_v26 = vrot.slane %v1159_v25, 1  ;;  %v1172_v27 = vadd.f32 %v1171_v23, %v1170_v24  ;;  %v1098_v23 = vld [vmem:[%s1955_s7] sm:$0x1] }
 0x17b   :  { %1475 = vmatprep.subr.bf16.mxu1 %v1564_v47 }
 0x17c   :  { %v1161_v28 = vadd.f32 %v1160_v26, %v1159_v25  ;;  %v1173_v29 = vrot.slane %v1172_v27, 1 }
 0x17e   :  { %1476 = vmatpush3.bf16.msra.mxu1 %v1564_v47  ;;  %v1174_v30 = vadd.f32 %v1173_v29, %v1172_v27  ;;  %v1175_v31 = vmul.f32 0.03125, %v1161_v28 }
 0x17f   :  { %1477 = vmatprep.subr.bf16.mxu1 %v1565_v6 }
 0x180   :  { %v1176_v32 = vmul.f32 0.03125, %v1174_v30  ;;  %v1177_v33 = vmul.f32 %v1175_v31, %v1175_v31 }
 0x182   :  { %1478 = vmatpush3.bf16.msra.mxu1 %v1565_v6  ;;  %v1178_v34 = vsub.f32 %v1176_v32, %v1177_v33 }
 0x183   :  { %1479 = vmatprep.subr.bf16.mxu1 %v1566_v48 }
 0x184   :  { %v1179_v36 = vmax.f32 %v1178_v34, 0.0 }
 0x186   :  { %1480 = vmatpush3.bf16.msra.mxu1 %v1566_v48  ;;  %v1180_v35 = vadd.f32 1e-05, %v1179_v36 }
 0x187   :  { %1481 = vmatprep.subr.bf16.mxu1 %v1567_v51 }
 0x188   :  { %1579 = vrsqrt.f32 %v1180_v35 }
 0x18a   :  { %1482 = vmatpush3.bf16.msra.mxu1 %v1567_v51 }
 0x18b   :  { %1487 = vmatprep.subr.bf16.mxu1 %v1569_v55 }
 0x18d   :  { %1484 = vmatmul.mubr.bf16.vlgmr.msra.gmra.mrb[0].mxu1 %v1288_v59 }
 0x18e   :  { %1488 = vmatpush3.bf16.msra.mxu1 %v1569_v55  ;;  %1503 = vmatprep.mubr.bf16.mxu1 %v1315_v61 }
 0x18f   :  { %1489 = vmatprep.subr.bf16.mxu1 %v1570_v58 }
 0x192   :  { %1490 = vmatpush3.bf16.msra.mxu1 %v1570_v58  ;;  %v1580_v38 = vpop.eup %1579 }
 0x193   :  { %1491 = vmatprep.subr.bf16.mxu1 %v1571_v63  ;;  %v1182_v39 = vmul.f32 %v1580_v38, %v1151_v37 }
 0x195   :  { %v1183_v41 = vmul.f32 %v1182_v39, %v1175_v31  ;;  %v1189_v42 = vrot.slane %v1182_v39, %v1797_v62 }
 0x196   :  { %1492 = vmatpush3.bf16.msra.mxu1 %v1571_v63 }
 0x197   :  { %1493 = vmatprep.subr.bf16.mxu1 %v1572_v0  ;;  %v1184_v43 = vsub.f32 %v1152_v40, %v1183_v41  ;;  %v1192_v45 = vmul.f32 %v1189_v42, %v487_v9  ;;  %v1193_v46 = vmul.f32 %v1445_v4, %v1189_v42  ;;  %v1194_v47 = vmul.f32 %v1446_v8, %v1189_v42 }
 0x199   :  { %v1199_v6 = vrot.slane %v1184_v43, %v1797_v62 }
 0x19a   :  { %1494 = vmatpush3.bf16.msra.mxu1 %v1572_v0 }
 0x19b   :  { %1495 = vmatprep.subr.bf16.mxu1 %v1573_v50  ;;  %v1202_v49 = vadd.f32 %v1199_v6, %v1192_v45  ;;  %v1203_v51 = vadd.f32 %v1199_v6, %v1193_v46  ;;  %v1204_v52 = vadd.f32 %v1199_v6, %v1194_v47 }
 0x19e   :  { %1496 = vmatpush3.bf16.msra.mxu1 %v1573_v50 }
 0x19f   :  { %1497 = vmatprep.subr.bf16.mxu1 %v1574_v1 }
 0x1a2   :  { %1498 = vmatpush3.bf16.msra.mxu1 %v1574_v1 }
 0x1a3   :  { %1499 = vmatprep.subr.bf16.mxu1 %v1575_v2 }
 0x1a6   :  { %1500 = vmatpush3.bf16.msra.mxu1 %v1575_v2 }
 0x1a7   :  { %1501 = vmatprep.subr.bf16.mxu1 %v1576_v3 }
 0x1aa   :  { %1502 = vmatpush3.bf16.msra.mxu1 %v1576_v3 }
 0x1ad   :  { %1504 = vmatmul.mubr.bf16.vlgmr.msra.gmra.mrb[0].mxu1 %v1316_v44  ;;  %v1191_v44 = vmul.f32 %v1189_v42, %v484_v5 }
 0x1af   :  { %v1201_v48 = vadd.f32 %v1199_v6, %v1191_v44 }
 0x280   :  { %v1505_v53 = vpop.f32.mrb[0].mxu1 }
 0x281   :  { %v1078_v54 = vpop.f32.mrb[1].mxu1  ;;  %v1110_v58 = vmul.f32 %v1505_v53, %v1505_v53 }
 0x282   :  { %v1506_v55 = vpop.f32.mrb[2].mxu1  ;;  %v1108_v57 = vmul.f32 %v1078_v54, %v1078_v54 }
 0x283   :  { %v1081_v56 = vpop.f32.mrb[3].mxu1  ;;  %v1111_v0 = vmul.f32 %v1506_v55, %v1506_v55 }
 0x284   :  { %v1099_v59 = vadd.f32 %v1081_v56, %v1078_v54  ;;  %v1109_v60 = vmul.f32 %v1081_v56, %v1081_v56 }
 0x286   :  { %v1100_v61 = vadd.f32 %v1505_v53, %v1099_v59  ;;  %v1112_v63 = vadd.f32 %v1109_v60, %v1108_v57 }
 0x288   :  { %v1101_v50 = vadd.f32 %v1506_v55, %v1100_v61  ;;  %v1113_v1 = vadd.f32 %v1112_v63, %v1110_v58 }
 0x28a   :  { %v1102_v2 = vrot.slane %v1101_v50, 4  ;;  %v1114_v3 = vadd.f32 %v1113_v1, %v1111_v0 }
 0x28c   :  { %v1103_v4 = vadd.f32 %v1102_v2, %v1101_v50  ;;  %v1115_v5 = vrot.slane %v1114_v3, 4 }
 0x28e   :  { %v1104_v7 = vrot.slane %v1103_v4, 2  ;;  %v1116_v8 = vadd.f32 %v1115_v5, %v1114_v3 }
 0x290   :  { %v1105_v9 = vadd.f32 %v1104_v7, %v1103_v4  ;;  %v1117_v10 = vrot.slane %v1116_v8, 2 }
 0x292   :  { %v1106_v11 = vrot.slane %v1105_v9, 1  ;;  %v1118_v12 = vadd.f32 %v1117_v10, %v1116_v8 }
 0x294   :  { %v1107_v13 = vadd.f32 %v1106_v11, %v1105_v9  ;;  %v1119_v14 = vrot.slane %v1118_v12, 1 }
 0x296   :  { %v1120_v15 = vadd.f32 %v1119_v14, %v1118_v12  ;;  %v1121_v16 = vmul.f32 0.03125, %v1107_v13 }
 0x298   :  { %v1122_v17 = vmul.f32 0.03125, %v1120_v15  ;;  %v1123_v18 = vmul.f32 %v1121_v16, %v1121_v16 }
 0x29a   :  { %v1124_v19 = vsub.f32 %v1122_v17, %v1123_v18 }
 0x29c   :  { %v1125_v20 = vmax.f32 %v1124_v19, 0.0 }
 0x29e   :  { %v1126_v21 = vadd.f32 1e-05, %v1125_v20 }
 0x2a0   :  { %1581 = vrsqrt.f32 %v1126_v21 }
 0x2aa   :  { %v1582_v24 = vpop.eup %1581 }
 0x2ab   :  { %v1128_v25 = vmul.f32 %v1582_v24, %v1097_v22 }
 0x2ad   :  { %v1129_v26 = vmul.f32 %v1128_v25, %v1121_v16  ;;  %v1135_v27 = vrot.slane %v1128_v25, %v1797_v62 }
 0x2af   :  { %v1130_v28 = vsub.f32 %v1098_v23, %v1129_v26  ;;  %v1137_v29 = vmul.f32 %v1135_v27, %v1078_v54  ;;  %v1138_v30 = vmul.f32 %v1135_v27, %v1081_v56  ;;  %v1139_v31 = vmul.f32 %v1505_v53, %v1135_v27 }
 0x2b0   :  { %v1140_v32 = vmul.f32 %v1506_v55, %v1135_v27 }
 0x2b1   :  { %v1145_v33 = vrot.slane %v1130_v28, %v1797_v62 }
 0x2b3   :  { %v1147_v34 = vadd.f32 %v1145_v33, %v1137_v29  ;;  %v1148_v36 = vadd.f32 %v1145_v33, %v1138_v30  ;;  %v1149_v35 = vadd.f32 %v1145_v33, %v1139_v31  ;;  %v1150_v37 = vadd.f32 %v1145_v33, %v1140_v32 }
 0x2b5   :  { %v1205_v38 = vadd.f32 %v1201_v48, %v1147_v34  ;;  %v1206_v39 = vadd.f32 %v1202_v49, %v1148_v36  ;;  %v1207_v40 = vadd.f32 %v1203_v51, %v1149_v35  ;;  %v1208_v41 = vadd.f32 %v1204_v52, %v1150_v37 }
 0x2b7   :  { %v1209_v42 = vmax.f32 %v1205_v38, 0.0  ;;  %v1210_v43 = vmax.f32 %v1206_v39, 0.0  ;;  %v1211_v44 = vmax.f32 %v1207_v40, 0.0  ;;  %v1212_v45 = vmax.f32 %v1208_v41, 0.0 }
 0x2b9   :  { %1213 = vst [vmem:[%s1956_s10] sm:$0xff] %v1209_v42  ;;  %1214 = vst [vmem:[%s1956_s10 + $0x8] sm:$0xff] %v1210_v43 }
 0x2ba   :  { %1215 = vst [vmem:[%s1956_s10 + $0x10] sm:$0xff] %v1211_v44  ;;  %1216 = vst [vmem:[%s1956_s10 + $0x18] sm:$0xff] %v1212_v45 }

</bundles_post_ra>
